<compile_context>
chip_gen: v7x
topology: tpu7x:2x2x1
jax: 0.10.0
libtpu: 0.0.40
codegen_flags: <defaults>
</compile_context>

<pallas_src>
import jax
import jax.numpy as jnp
from jax.experimental import pallas as pl
from jax.experimental.pallas import tpu as pltpu


def _round_up(x, m):
    return ((x + m - 1) // m) * m


def _concat_squash_kernel(x_ref, w_ref, gate_ref, bias_ref, o_ref):
    # x_ref:    (TM, K_pad)      row tile of points for one batch element
    # w_ref:    (K_pad, O_pad)   resident W^T (same block every step)
    # gate_ref: (1, O_pad)       per-batch gate, broadcasts over TM rows
    # bias_ref: (1, O_pad)       per-batch effective bias = b*gate + ctx@Wb^T
    a = jnp.dot(x_ref[...], w_ref[...], preferred_element_type=jnp.float32)
    o_ref[...] = (a * gate_ref[...] + bias_ref[...]).astype(o_ref.dtype)


def concat_squash_linear(ctx, x, W, b, Wg, bg, Wb, *, tm=256):
    """ctx: (B, 1, dim_ctx), x: (B, N, dim_in).
    W: (dim_out, dim_in) [PyTorch Linear layout], b: (dim_out,)
    Wg: (dim_out, dim_ctx), bg: (dim_out,), Wb: (dim_out, dim_ctx)
    Returns (B, N, dim_out)."""
    B, N, dim_in = x.shape
    dim_out = W.shape[0]

    # ---- hyper-network path: tiny (B,1,*) matmuls, done in plain JAX (f32) ----
    gate = jax.nn.sigmoid(
        jnp.einsum("bci,oi->bco", ctx.astype(jnp.float32), Wg.astype(jnp.float32))
        + bg.astype(jnp.float32))                                   # (B, 1, dim_out)
    bias_eff = gate * b.astype(jnp.float32) + jnp.einsum(
        "bci,oi->bco", ctx.astype(jnp.float32), Wb.astype(jnp.float32))  # b folded in

    # ---- pad to MXU/lane-friendly sizes ----
    TM = min(tm, _round_up(N, 8))          # row tile: multiple of 8 sublanes (f32)
    N_pad = _round_up(N, TM)
    K_pad = _round_up(dim_in, 128)
    O_pad = _round_up(dim_out, 128)

    x_p = jnp.pad(x, ((0, 0), (0, N_pad - N), (0, K_pad - dim_in)))
    Wt_p = jnp.pad(W.T, ((0, K_pad - dim_in), (0, O_pad - dim_out)))     # (K_pad, O_pad)
    gate_p = jnp.pad(gate, ((0, 0), (0, 0), (0, O_pad - dim_out)))
    bias_p = jnp.pad(bias_eff, ((0, 0), (0, 0), (0, O_pad - dim_out)))

    grid = (B, N_pad // TM)

    out = pl.pallas_call(
        _concat_squash_kernel,
        out_shape=jax.ShapeDtypeStruct((B, N_pad, O_pad), x.dtype),
        grid_spec=pltpu.PrefetchScalarGridSpec(
            num_scalar_prefetch=0,
            grid=grid,
            in_specs=[
                # x: (TM, K_pad) tile, batch dim squeezed away
                pl.BlockSpec((pl.Squeezed(), TM, K_pad), lambda bi, ni: (bi, ni, 0)),
                # W^T: resident, same block for every grid step
                pl.BlockSpec((K_pad, O_pad), lambda bi, ni: (0, 0)),
                # per-batch gate / effective-bias rows
                pl.BlockSpec((pl.Squeezed(), 1, O_pad), lambda bi, ni: (bi, 0, 0)),
                pl.BlockSpec((pl.Squeezed(), 1, O_pad), lambda bi, ni: (bi, 0, 0)),
            ],
            out_specs=pl.BlockSpec((pl.Squeezed(), TM, O_pad),
                                   lambda bi, ni: (bi, ni, 0)),
        ),
        compiler_params=pltpu.CompilerParams(
            dimension_semantics=("parallel", "parallel")),
    )(x_p, Wt_p, gate_p, bias_p)

    # Slice off row / lane padding.
    return out[:, :N, :dim_out]


def _reference(ctx, x, W, b, Wg, bg, Wb):
    a = jnp.einsum("bni,oi->bno", x, W) + b
    gate = jax.nn.sigmoid(jnp.einsum("bci,oi->bco", ctx, Wg) + bg)
    bias = jnp.einsum("bci,oi->bco", ctx, Wb)
    return a * gate + bias


if __name__ == "__main__":
    B, N = 2, 8
    dim_in, dim_out, dim_ctx = 32, 32, 8

    key = jax.random.PRNGKey(0)
    kx, kc, kw, kb, kwg, kbg, kwb = jax.random.split(key, 7)

    x = jax.random.normal(kx, (B, N, dim_in), dtype=jnp.float32)
    ctx = jax.random.normal(kc, (B, 1, dim_ctx), dtype=jnp.float32)

    # PyTorch-Linear-shaped parameters (weight: (out, in)).
    W = jax.random.normal(kw, (dim_out, dim_in), dtype=jnp.float32) * 0.1
    b = jax.random.normal(kb, (dim_out,), dtype=jnp.float32) * 0.1
    Wg = jax.random.normal(kwg, (dim_out, dim_ctx), dtype=jnp.float32) * 0.1
    bg = jax.random.normal(kbg, (dim_out,), dtype=jnp.float32) * 0.1
    Wb = jax.random.normal(kwb, (dim_out, dim_ctx), dtype=jnp.float32) * 0.1

    out = concat_squash_linear(ctx, x, W, b, Wg, bg, Wb)
    out = jax.block_until_ready(out)

    ref = _reference(ctx, x, W, b, Wg, bg, Wb)
    assert out.shape == (B, N, dim_out)
    assert jnp.allclose(out, ref, atol=1e-5, rtol=1e-5), "mismatch vs reference"

    print("KERNEL_OK")
</pallas_src>

<mosaic_0001>
module attributes {stable_mosaic.version = 11 : i64} {
  func.func @_concat_squash_kernel(%arg0: i32, %arg1: i32, %arg2: memref<1x8x128xf32, #tpu.memory_space<vmem>>, %arg3: memref<128x128xf32, #tpu.memory_space<vmem>>, %arg4: memref<1x1x128xf32, #tpu.memory_space<vmem>>, %arg5: memref<1x1x128xf32, #tpu.memory_space<vmem>>, %arg6: memref<1x8x128xf32, #tpu.memory_space<vmem>>) attributes {dimension_semantics = [#tpu.dimension_semantics<parallel>, #tpu.dimension_semantics<parallel>], iteration_bounds = array<i64: 2, 1>, scalar_prefetch = 0 : i64, scratch_operands = 0 : i64, tpu.core_type = #tpu.core_type<tc>, window_params = [{transform_indices = @transform_0, window_bounds = array<i64: 1, 8, 128>}, {pipeline_mode = #tpu.pipeline_mode<synchronous>, transform_indices = @transform_1, window_bounds = array<i64: 128, 128>}, {transform_indices = @transform_2, window_bounds = array<i64: 1, 1, 128>}, {transform_indices = @transform_3, window_bounds = array<i64: 1, 1, 128>}, {transform_indices = @transform_4, window_bounds = array<i64: 1, 8, 128>}]} {
    %c0 = arith.constant 0 : index
    %c0_0 = arith.constant 0 : index
    %c0_1 = arith.constant 0 : index
    %0 = vector.load %arg2[%c0, %c0_0, %c0_1] : memref<1x8x128xf32, #tpu.memory_space<vmem>>, vector<1x8x128xf32>
    %1 = vector.shape_cast %0 : vector<1x8x128xf32> to vector<8x128xf32>
    %c0_2 = arith.constant 0 : index
    %c0_3 = arith.constant 0 : index
    %2 = vector.load %arg3[%c0_2, %c0_3] : memref<128x128xf32, #tpu.memory_space<vmem>>, vector<128x128xf32>
    %cst = arith.constant dense<0.000000e+00> : vector<8x128xf32>
    %3 = tpu.matmul %1, %2, %cst {dimension_numbers = #tpu.dot_dimension_numbers<[1], [0], [0], [1], [0, 0, 1, 1], [], []>} : vector<8x128xf32>, vector<128x128xf32>, vector<8x128xf32> -> vector<8x128xf32>
    %c0_4 = arith.constant 0 : index
    %c0_5 = arith.constant 0 : index
    %c0_6 = arith.constant 0 : index
    %4 = vector.load %arg4[%c0_4, %c0_5, %c0_6] : memref<1x1x128xf32, #tpu.memory_space<vmem>>, vector<1x1x128xf32>
    %5 = vector.shape_cast %4 : vector<1x1x128xf32> to vector<1x128xf32>
    %6 = vector.broadcast %5 : vector<1x128xf32> to vector<8x128xf32>
    %7 = arith.mulf %3, %6 : vector<8x128xf32>
    %c0_7 = arith.constant 0 : index
    %c0_8 = arith.constant 0 : index
    %c0_9 = arith.constant 0 : index
    %8 = vector.load %arg5[%c0_7, %c0_8, %c0_9] : memref<1x1x128xf32, #tpu.memory_space<vmem>>, vector<1x1x128xf32>
    %9 = vector.shape_cast %8 : vector<1x1x128xf32> to vector<1x128xf32>
    %10 = vector.broadcast %9 : vector<1x128xf32> to vector<8x128xf32>
    %11 = arith.addf %7, %10 : vector<8x128xf32>
    %c0_10 = arith.constant 0 : index
    %c0_11 = arith.constant 0 : index
    %c0_12 = arith.constant 0 : index
    %12 = vector.load %arg6[%c0_10, %c0_11, %c0_12] : memref<1x8x128xf32, #tpu.memory_space<vmem>>, vector<1x8x128xf32>
    %13 = vector.shape_cast %12 : vector<1x8x128xf32> to vector<8x128xf32>
    %14 = vector.shape_cast %11 : vector<8x128xf32> to vector<1x8x128xf32>
    tpu.vector_store %arg6[%c0_10, %c0_11, %c0_12], %14 {strides = array<i32>} : memref<1x8x128xf32, #tpu.memory_space<vmem>>, vector<1x8x128xf32>,
    return
  }
  func.func @transform_0(%arg0: i32, %arg1: i32) -> (i32, i32, i32) {
    %c0_i32 = arith.constant 0 : i32
    %c0_i32_0 = arith.constant 0 : i32
    return %arg0, %arg1, %c0_i32 : i32, i32, i32
  }
  func.func @transform_1(%arg0: i32, %arg1: i32) -> (i32, i32) {
    %c0_i32 = arith.constant 0 : i32
    %c0_i32_0 = arith.constant 0 : i32
    %c0_i32_1 = arith.constant 0 : i32
    return %c0_i32, %c0_i32_0 : i32, i32
  }
  func.func @transform_2(%arg0: i32, %arg1: i32) -> (i32, i32, i32) {
    %c0_i32 = arith.constant 0 : i32
    %c0_i32_0 = arith.constant 0 : i32
    %c0_i32_1 = arith.constant 0 : i32
    return %arg0, %c0_i32, %c0_i32_0 : i32, i32, i32
  }
  func.func @transform_3(%arg0: i32, %arg1: i32) -> (i32, i32, i32) {
    %c0_i32 = arith.constant 0 : i32
    %c0_i32_0 = arith.constant 0 : i32
    %c0_i32_1 = arith.constant 0 : i32
    return %arg0, %c0_i32, %c0_i32_0 : i32, i32, i32
  }
  func.func @transform_4(%arg0: i32, %arg1: i32) -> (i32, i32, i32) {
    %c0_i32 = arith.constant 0 : i32
    %c0_i32_0 = arith.constant 0 : i32
    return %arg0, %arg1, %c0_i32 : i32, i32, i32
  }
}

</mosaic_0001>

<bundles_post_ra>
// kernel: tpu_custom_call.1
= control target key start
LH: loop header
LB: loop body
LE: loop exit
PB: predicated region body
PF: predicated region fallthrough
CT: control target
= control target key end

     0   :  { %9 = vsyncpa [#allocation3], 0  ;;  %s1079_s0 = inlined_call_operand.hbm [shape: f32[2,8,128], index: 0, kind: input, shape index: {}]   ;;  %s1080_s1 = inlined_call_operand.hbm [shape: f32[128,128], index: 1, kind: input, shape index: {}]   ;;  %s1081_s2 = inlined_call_operand.vmem [shape: f32[2,1,128], index: 2, kind: input, shape index: {}]   ;;  %s1082_s3 = inlined_call_operand.vmem [shape: f32[2,1,128], index: 3, kind: input, shape index: {}]   ;;  %s1083_s4 = inlined_call_operand.hbm [shape: f32[2,8,128], index: 4, kind: output, shape index: {}]  }
   0x1   :  { %11 = vsyncpa [#allocation3 + $0x1], 0 }
   0x2   :  { %12 = vsyncpa [#allocation6], 0 }
   0x3   :  { %13 = vsyncpa [#allocation4], 0 }
   0x4   :  { %15 = vsyncpa [#allocation4 + $0x1], 0  ;;  %s850_s15 = smov 0   ;;  %s852_s16 = smov 0  }
   0x5   :  { %s854_s17 = smov 0   ;;  %s856_s18 = smov 0  }
   0x6   :  { %s858_s19 = smov 0   ;;  %s860_s20 = smov 0  }
   0x7 LB: > { %s500_s21 = sadd.s32 4294967295, %s815_s20   ;;  %s501_s22 = sadd.s32 4294967294, %s815_s20   ;;  %s815_s20 = sphi %s860_s20, %s21_s20   ;;  %s811_s19 = sphi %s858_s19, %s1107_s19   ;;  %s807_s18 = sphi %s856_s18, %s1106_s18   ;;  %s803_s17 = sphi %s854_s17, %s1105_s17   ;;  %s799_s16 = sphi %s852_s16, %s1104_s16   ;;  %s795_s15 = sphi %s850_s15, %s1103_s15  }
   0x8   : > { %p55_p0 = scmp.ne.s32.totalorder %s799_s16, %s795_s15  ;;  %p884_p1 = scmp.eq.s32.totalorder %s500_s21, 0 }
   0x9   : > { %p888_p2 = scmp.eq.s32.totalorder %s500_s21, 1  ;;  %p160_p3 = scmp.eq.s32.totalorder %s501_s22, 1 }
   0xa   : > { %s1088_s23 = scalar_select %p884_p1, 1, 0 }
   0xb   : > { %s1089_s24 = scalar_select %p888_p2, 1, 0 }
   0xc   : > { %p894_p4 = por %p884_p1, %p55_p0  ;;  %p502_p5 = scmp.ge.s32.totalorder %s815_s20, 1 }
   0xd   : > { %p899_p6 = por %p160_p3, %p55_p0  ;;  %p167_p7 = scmp.lt.s32.totalorder %s815_s20, 3 }
   0xe   : > { %s1090_s25 = scalar_select %p894_p4, 1, 0 }
   0xf   : > { %s1091_s26 = scalar_select %p899_p6, 1, 0 }
  0x10   : > { %p904_p8 = pnand %p502_p5, %p167_p7  ;;  %s817_s28 = smov [#allocation5]  }
  0x11   : > { %s179_s29 = sshll.u32 %s817_s28, 4  ;;  %s33_s5 = sadd.s32 1, %s811_s19  ;;  %s180_s29 = int_to_ptr.vmem [resolvable:$true] %s179_s29 }
  0x12   : > { %s1092_s27 = scalar_select %p904_p8, 1, 0 }
  0x13   : > { %p601_p9 = pneg %p904_p8  ;;  %s671_s8 = scalar_lea.hbm %s1080_s1, 2048 }
  0x14   : > { %p672_p12 = scmp.ne.s32.totalorder %s1080_s1, %s671_s8  ;;  %p678_p5 = scmp.lt.u32.totalorder %s671_s8, %s1080_s1 }
  0x15   : > { %p913_p11 = pnand %p601_p9, %p884_p1 }
  0x17   : > { %p673_p13 = pneg %p913_p11 }
  0x19   : > { %p674_p0 = pnand %p673_p13, %p672_p12 }
  0x1b   : > { %p675_p3 = pneg %p674_p0 }
  0x1d   : > { %p680_p7 = pnand %p678_p5, %p675_p3 }
  0x1f   : > { %683 = shalt.err (!%p680_p7)
}
  0x20   : > { %s684_s13 = scalar_lea.vmem %s180_s29, 2048  ;;  %p692_p1 = scmp.lt.s32.totalorder %s180_s29, %s180_s29 }
  0x21   : > { %p685_p9 = scmp.ne.s32.totalorder %s180_s29, %s684_s13  ;;  %p693_p4 = scmp.lt.s32.totalorder %s684_s13, %s684_s13 }
  0x23   : > { %p687_p10 = pnand %p685_p9, %p673_p13  ;;  %p694_p8 = por %p693_p4, %p692_p1 }
  0x25   : > { %p688_p6 = pneg %p687_p10 }
  0x27   : > { %p695_p2 = pnand %p694_p8, %p688_p6 }
  0x29   : > { %698 = shalt.err (!%p695_p2)
}
  0x2a   : > { %s818_s14 = smov 128   ;;  %s819_s21 = smov 8  }
  0x2b   : > { %604 = dma.hbm_to_vmem [thread:$0]  (!%p913_p11), %s1080_s1, 2048, %s180_s29, [#allocation6], %s818_s14, %s818_s14, %s819_s21  }
  0x2c   : > { %p35_p1 = scmp.ge.s32.totalorder %s33_s5, 2  ;;  %s42_s6 = sadd.s32 1, %s803_s17 }
  0x2d   : > { %p49_p2 = scmp.ne.s32.totalorder %s803_s17, %s799_s16  ;;  %p50_p4 = scmp.eq.s32.totalorder %s815_s20, 0 }
  0x2e   : > { %s1109_s5 = smov (%p35_p1, %s33_s5), 0  ;;  %p1095_p8 = scmp.ne.s32.totalorder %s1089_s24, 0 }
  0x2f   : > { %p940_p6 = por %p50_p4, %p49_p2  ;;  %s37_s30 = ssub.s32 %s811_s19, %s1109_s5 }
  0x30   : > { %p946_p10 = por %p1095_p8, %p49_p2  ;;  %p614_p12 = scmp.lt.s32.totalorder %s815_s20, 2 }
  0x31   : > { %p40_p11 = scmp.eq.s32.totalorder %s37_s30, 0  ;;  %s193_s29 = sand.u32 1, %s803_s17  }
  0x32   : > { %s505_s9 = sshll.u32 %s193_s29, 3  ;;  %s506_s11 = sshll.u32 %s811_s19, 7 }
  0x33   : > { %s955_s10 = scalar_select %p40_p11, %s803_s17, %s42_s6  }
  0x34   : > { %s961_s14 = scalar_lea.hbm %s1079_s0, %s506_s11  ;;  %s197_s24 = scalar_lea.vmem [#allocation2], %s505_s9 }
  0x35   : > { %s205_s21 = sshll.u32 %s197_s24, 4  ;;  %p967_p13 = pnand %p614_p12, %p940_p6  ;;  %s963_s21 = int_to_ptr.vmem [resolvable:$true] %s205_s21 }
  0x36   : > { %s194_s28 = scalar_lea.sflag [#allocation3], %s193_s29  ;;  %s699_s6 = scalar_lea.hbm %s961_s14, 128 }
  0x37   : > { %p700_p0 = scmp.ne.s32.totalorder %s961_s14, %s699_s6  ;;  %p701_p3 = pneg %p967_p13 }
  0x38   : > { %s704_s11 = scalar_lea.hbm %s1079_s0, 256  ;;  %p705_p9 = scmp.lt.u32.totalorder %s961_s14, %s1079_s0 }
  0x39   : > { %p702_p5 = pnand %p701_p3, %p700_p0  ;;  %p706_p1 = scmp.lt.u32.totalorder %s704_s11, %s699_s6 }
  0x3a   : > { %p708_p4 = scmp.lt.u32.totalorder %s699_s6, %s961_s14 }
  0x3b   : > { %p703_p7 = pneg %p702_p5  ;;  %p707_p2 = por %p706_p1, %p705_p9 }
  0x3d   : > { %p709_p6 = por %p708_p4, %p707_p2 }
  0x3f   : > { %p710_p8 = pnand %p709_p6, %p703_p7 }
  0x41   : > { %713 = shalt.err (!%p710_p8)
}
  0x42   : > { %s714_s29 = scalar_lea.vmem %s963_s21, 128  ;;  %s820_s13 = smov [#allocation2]  }
  0x43   : > { %p715_p12 = scmp.ne.s32.totalorder %s963_s21, %s714_s29  ;;  %s719_s24 = sshll.u32 %s820_s13, 4  ;;  %s720_s24 = int_to_ptr.vmem [resolvable:$false] %s719_s24 }
  0x44   : > { %s721_s30 = scalar_lea.vmem %s720_s24, 256  ;;  %p722_p5 = scmp.lt.s32.totalorder %s963_s21, %s720_s24 }
  0x45   : > { %p717_p11 = pnand %p715_p12, %p701_p3  ;;  %p723_p9 = scmp.lt.s32.totalorder %s721_s30, %s714_s29 }
  0x47   : > { %p718_p0 = pneg %p717_p11  ;;  %p724_p1 = por %p723_p9, %p722_p5 }
  0x49   : > { %p725_p2 = pnand %p724_p1, %p718_p0 }
  0x4b   : > { %728 = shalt.err (!%p725_p2)
}
  0x4c   : > { %608 = dma.hbm_to_vmem [thread:$0]  (!%p967_p13), %s961_s14, 128, %s963_s21, %s194_s28  }
  0x4d   : > { %p1098_p7 = scmp.ne.s32.totalorder %s1092_s27, 0 }
  0x4e   : > { %s999_s6 = sand.u32 (!%p1098_p7), 1, %s799_s16   ;;  %p1099_p3 = scmp.ne.s32.totalorder (!%p1098_p7), %s1090_s25, 0 }
  0x4f   : > { %226 = sbr.rel (%p1098_p7) target bundleno = 355 (0x163), region = 36  ;;  %s508_s9 = sshll.u32 (!%p1098_p7), %s999_s6, 3 }
  0x50   : > { %s229_s11 = scalar_lea.sflag (!%p1098_p7), [#allocation3], %s999_s6  ;;  %s1005_s7 = scalar_lea.vmem (!%p1098_p7), [#allocation2], %s508_s9 }
  0x56   : > { %782 = dma.done.wait (%p1099_p3), %s229_s11, 128  }
  0x57   : > { %784 = vsyncadd (%p1099_p3), %s229_s11, 4294967168  ;;  %p1100_p13 = scmp.ne.s32.totalorder %s1088_s23, 0 }
  0x59   : > { %786 = dma.done.wait (%p1100_p13), [#allocation6], 2048  }
  0x5a   : > { %788 = vsyncadd (%p1100_p13), [#allocation6], 4294965248  ;;  %v821_v0 = vmov 0.0|0.0   ;;  %vm822_vm0 = vmmov 0   ;;  %v823_v1 = vmov 0.0   ;;  %v274_v2 = vld [vmem:[#allocation5] sm:$0xff] }
  0x5b   : > { %569 = vmatprep.subr.bf16.mxu0 %v821_v0  ;;  %566 = vmatprep.mubr.msk.f32.mxu0 %vm822_vm0, %v823_v1  ;;  %v275_v3 = vld [vmem:[#allocation5 + $0x8] sm:$0xff]  ;;  %v276_v4 = vld [vmem:[#allocation5 + $0x10] sm:$0xff]  ;;  %v277_v6 = vld [vmem:[#allocation5 + $0x18] sm:$0xff]  ;;  %p267_p4 = scmp.lt.s32.totalorder %s807_s18, 1  ;;  %s514_s12 = sshll.u32 %s807_s18, 7 }
  0x5c   : > { %v570_v5 = vpack.c.bf16 %v275_v3, %v274_v2  ;;  %v573_v7 = vpack.c.bf16 %v277_v6, %v276_v4  ;;  %v278_v8 = vld [vmem:[#allocation5 + $0x20] sm:$0xff]  ;;  %v279_v9 = vld [vmem:[#allocation5 + $0x28] sm:$0xff]  ;;  %v280_v11 = vld [vmem:[#allocation5 + $0x30] sm:$0xff]  ;;  %s266_s29 = scalar_lea.vmem [#allocation7], %s508_s9  ;;  %s1030_s11 = scalar_lea.hbm %s1083_s4, %s514_s12 }
  0x5d   : > { %v576_v10 = vpack.c.bf16 %v279_v9, %v278_v8  ;;  %v281_v12 = vld [vmem:[#allocation5 + $0x38] sm:$0xff]  ;;  %v282_v14 = vld [vmem:[#allocation5 + $0x40] sm:$0xff]  ;;  %v283_v15 = vld [vmem:[#allocation5 + $0x48] sm:$0xff]  ;;  %s268_s23 = scalar_select %p267_p4, %s807_s18, 1 }
  0x5e   : > { %571 = vmatpush3.bf16.msra.mxu0 %v570_v5  ;;  %v579_v13 = vpack.c.bf16 %v281_v12, %v280_v11  ;;  %v582_v16 = vpack.c.bf16 %v283_v15, %v282_v14  ;;  %v284_v17 = vld [vmem:[#allocation5 + $0x50] sm:$0xff]  ;;  %v285_v18 = vld [vmem:[#allocation5 + $0x58] sm:$0xff]  ;;  %v286_v20 = vld [vmem:[#allocation5 + $0x60] sm:$0xff]  ;;  %s392_s13 = sshll.u32 %s266_s29, 4  ;;  %s824_s18 = smov [#allocation7]   ;;  %s1032_s13 = int_to_ptr.vmem [resolvable:$true] %s392_s13 }
  0x5f   : > { %572 = vmatprep.subr.bf16.mxu0 %v821_v0  ;;  %v585_v19 = vpack.c.bf16 %v285_v18, %v284_v17  ;;  %v287_v21 = vld [vmem:[#allocation5 + $0x68] sm:$0xff]  ;;  %v288_v23 = vld [vmem:[#allocation5 + $0x70] sm:$0xff]  ;;  %v289_v24 = vld [vmem:[#allocation5 + $0x78] sm:$0xff]  ;;  %s269_s14 = scalar_lea.vmem %s1081_s2, %s268_s23  ;;  %s272_s28 = scalar_lea.vmem %s1082_s3, %s268_s23 }
  0x60   : > { %v588_v22 = vpack.c.bf16 %v287_v21, %v286_v20  ;;  %v591_v25 = vpack.c.bf16 %v289_v24, %v288_v23  ;;  %v273_v26 = vld [vmem:[%s1005_s7] sm:$0xff]  ;;  %s378_s7 = scalar_lea.sflag [#allocation4], %s999_s6  ;;  %s729_s23 = scalar_lea.vmem %s1032_s13, 128 }
  0x61   : > { %v511_v27 = vld [vmem:[%s269_s14] ss:$0 sm:$0xff]  ;;  %p730_p6 = scmp.ne.s32.totalorder %s1032_s13, %s729_s23  ;;  %s733_s9 = sshll.u32 %s824_s18, 4  ;;  %s734_s9 = int_to_ptr.vmem [resolvable:$false] %s733_s9 }
  0x62   : > { %574 = vmatpush3.bf16.msra.mxu0 %v573_v7  ;;  %v512_v29 = vld [vmem:[%s272_s28] ss:$0 sm:$0xff]  ;;  %s735_s25 = scalar_lea.vmem %s734_s9, 256  ;;  %p736_p11 = scmp.lt.s32.totalorder %s1032_s13, %s734_s9 }
  0x63   : > { %575 = vmatprep.subr.bf16.mxu0 %v821_v0  ;;  %p731_p8 = pnand %p730_p6, %p946_p10  ;;  %p737_p0 = scmp.lt.s32.totalorder %s735_s25, %s729_s23 }
  0x65   : > { %p732_p12 = pneg %p731_p8  ;;  %p738_p5 = por %p737_p0, %p736_p11 }
  0x66   : > { %577 = vmatpush3.bf16.msra.mxu0 %v576_v10 }
  0x67   : > { %578 = vmatprep.subr.bf16.mxu0 %v821_v0  ;;  %p739_p9 = pnand %p738_p5, %p732_p12 }
  0x6a   : > { %580 = vmatpush3.bf16.msra.mxu0 %v579_v13 }
  0x6b   : > { %581 = vmatprep.subr.bf16.mxu0 %v821_v0 }
  0x6e   : > { %583 = vmatpush3.bf16.msra.mxu0 %v582_v16 }
  0x6f   : > { %584 = vmatprep.subr.bf16.mxu0 %v821_v0 }
  0x72   : > { %586 = vmatpush3.bf16.msra.mxu0 %v585_v19 }
  0x73   : > { %587 = vmatprep.subr.bf16.mxu0 %v821_v0 }
  0x76   : > { %589 = vmatpush3.bf16.msra.mxu0 %v588_v22 }
  0x77   : > { %590 = vmatprep.subr.bf16.mxu0 %v821_v0 }
  0x7a   : > { %592 = vmatpush3.bf16.msra.mxu0 %v591_v25 }
  0x7d   : > { %567 = vmatmul.mubr.f32.vlgmr.msra.gmra.mrb[0].mxu0 %v273_v26 }
 0x150   : > { %v356_v28 = vpop.f32.mrb[0].mxu0 }
 0x151   : > { %v367_v30 = vmul.f32 %v511_v27, %v356_v28  ;;  %v568_v31 = vpop.f32.mrb[1].mxu0 }
 0x153   : > { %v375_v32 = vadd.f32 %v512_v29, %v367_v30 }
 0x155   : > { %376 = vst [vmem:[%s266_s29] sm:$0xff] %v375_v32 }
 0x156   : > { %742 = shalt.err (!%p739_p9)
}
 0x157   : > { %s743_s6 = scalar_lea.hbm %s1030_s11, 128  ;;  %s747_s21 = scalar_lea.hbm %s1083_s4, 256 }
 0x158   : > { %p744_p1 = scmp.ne.s32.totalorder %s1030_s11, %s743_s6  ;;  %p748_p3 = scmp.lt.u32.totalorder %s1030_s11, %s1083_s4 }
 0x159   : > { %p749_p13 = scmp.lt.u32.totalorder %s747_s21, %s743_s6  ;;  %p751_p6 = scmp.lt.u32.totalorder %s743_s6, %s1030_s11 }
 0x15a   : > { %p745_p2 = pnand %p744_p1, %p946_p10 }
 0x15b   : > { %p750_p4 = por %p749_p13, %p748_p3 }
 0x15c   : > { %p746_p7 = pneg %p745_p2 }
 0x15d   : > { %p752_p8 = por %p751_p6, %p750_p4 }
 0x15f   : > { %p753_p12 = pnand %p752_p8, %p746_p7 }
 0x161   : > { %756 = shalt.err (!%p753_p12)
}
 0x162   : > { %599 = dma.vmem_to_hbm [thread:$0]  (%p946_p10), %s1032_s13, 128, %s1030_s11, %s378_s7  }
 0x163 PF: > { %s404_s12 = sand.u32 1, %s795_s15   ;;  %p1101_p11 = scmp.ne.s32.totalorder %s1091_s26, 0 }
 0x164   : > { %p1102_p0 = scmp.ge.s32.totalorder %s815_s20, 2  ;;  %s405_s29 = scalar_lea.sflag [#allocation4], %s404_s12 }
 0x166   : > { %p610_p5 = pnand %p1102_p0, %p1101_p11 }
 0x168   : > { %790 = dma.done.wait (!%p610_p5), %s405_s29, 128  }
 0x169   : > { %792 = vsyncadd (!%p610_p5), %s405_s29, 4294967168  ;;  %s21_s20 = sadd.s32 1, %s815_s20   ;;  %s1103_s15 = smov %s799_s16 }
 0x16a   : > { %p18_p9 = scmp.ge.s32.totalorder %s21_s20, 4   ;;  %s1104_s16 = smov %s803_s17 }
 0x16b   : > { %s1105_s17 = smov %s955_s10  ;;  %s1106_s18 = smov %s811_s19 }
 0x16c   : > { %s1107_s19 = smov %s1109_s5  ;;  %20 = sbr.rel (!%p18_p9) target bundleno = 7 (0x7), region = 91 }
 0x173   :  { %410 = vsyncpa [#allocation3], 1 }
 0x174   :  { %412 = vsyncpa [#allocation3 + $0x1], 1 }
 0x175   :  { %413 = vsyncpa [#allocation6], 1 }
 0x176   :  { %414 = vsyncpa [#allocation4], 1 }
 0x177   :  { %416 = vsyncpa [#allocation4 + $0x1], 1 }

</bundles_post_ra>
